<compile_context>
chip_gen: v7x
topology: tpu7x:2x2x1
jax: 0.10.0
libtpu: 0.0.40
codegen_flags: <defaults>
</compile_context>

<pallas_src>
import math

import jax
import jax.numpy as jnp
from jax.experimental import pallas as pl

# small, module-consistent shapes
B, S, D, H, DFF = 2, 8, 32, 4, 64
DK = D // H
EPS = 1e-6


def _layer_norm(v, a, c):
    mean = jnp.mean(v, axis=-1, keepdims=True)
    # torch.Tensor.std defaults to unbiased (ddof=1)
    var = jnp.sum((v - mean) ** 2, axis=-1, keepdims=True) / (v.shape[-1] - 1)
    return a * (v - mean) / (jnp.sqrt(var) + EPS) + c


def encoder_layer_kernel(x_ref, bias_ref, wqkv_ref, wo_ref, w1_ref, w2_ref,
                         vec_ref, o_ref):
    x = x_ref[...]                          # (B*S, D) — all tokens, one slab

    # packed small vectors: one (8,128) tile, sliced by row
    vecs = vec_ref[...]
    bqkv = vecs[0:1, :3 * D]                # fused QKV bias (per-head [bq|bk|bv])
    bo   = vecs[1:2, :D]
    a1   = vecs[2:3, :D]
    c1   = vecs[3:4, :D]
    a2   = vecs[4:5, :D]
    c2   = vecs[5:6, :D]
    b1   = vecs[6:7, :DFF]
    b2   = vecs[7:8, :D]

    # ------------- sublayer 0: LN -> multi-head self-attention -> residual
    xn = _layer_norm(x, a1, c1)

    # single fused 2-D QKV projection: (B*S, D) @ (D, 3*D)
    qkv = jnp.dot(xn, wqkv_ref[...], preferred_element_type=jnp.float32) + bqkv

    # head-batched (B*H, S, 3*DK): static slices + one stack, emitted once
    qkv_h = jnp.stack(
        [qkv[b * S:(b + 1) * S, h * 3 * DK:(h + 1) * 3 * DK]
         for b in range(B) for h in range(H)], axis=0)
    q = qkv_h[:, :, 0 * DK:1 * DK]
    k = qkv_h[:, :, 1 * DK:2 * DK]
    v = qkv_h[:, :, 2 * DK:3 * DK]

    scale = 1.0 / math.sqrt(DK)
    s = jnp.einsum('nqd,nkd->nqk', q, k,
                   preferred_element_type=jnp.float32) * scale          # (B*H, S, S)
    s = s + bias_ref[...]                   # additive mask bias (B*H, 1, S)
    s = s - jnp.max(s, axis=-1, keepdims=True)
    p = jnp.exp(s)
    p = p * pl.reciprocal(jnp.sum(p, axis=-1, keepdims=True), approx=True)
    heads = jnp.einsum('nqk,nkd->nqd', p, v,
                       preferred_element_type=jnp.float32)               # (B*H, S, DK)

    # merge heads back into lanes, then one K=32 output projection
    attn_tok = jnp.concatenate(
        [jnp.concatenate([heads[b * H + h] for h in range(H)], axis=-1)
         for b in range(B)], axis=0)                                     # (B*S, D)
    attn = jnp.dot(attn_tok, wo_ref[...], preferred_element_type=jnp.float32) + bo
    x1 = x + attn                           # residual (dropout == identity in eval)

    # ------------- sublayer 1: LN -> position-wise feed-forward -> residual
    xn2 = _layer_norm(x1, a2, c2)
    hid = jnp.dot(xn2, w1_ref[...], preferred_element_type=jnp.float32) + b1
    hid = jnp.maximum(hid, 0.0)
    ff = jnp.dot(hid, w2_ref[...], preferred_element_type=jnp.float32) + b2
    o_ref[...] = x1 + ff


def _pad_row(v, width=128):
    return jnp.pad(v, ((0, 0), (0, width - v.shape[1])))


@jax.jit
def encoder_layer(x, mask, params):
    (wq, bq, wk, bk, wv, bv, wo, bo,
     a1, c1, a2, c2, w1, b1, w2, b2) = params

    # Wqkv columns grouped per head: head h -> [Wq_h | Wk_h | Wv_h] (3*DK cols)
    wqkv = jnp.concatenate([wq.reshape(D, H, DK),
                            wk.reshape(D, H, DK),
                            wv.reshape(D, H, DK)], axis=-1).reshape(D, 3 * D)
    bqkv = jnp.concatenate([bq.reshape(1, H, DK),
                            bk.reshape(1, H, DK),
                            bv.reshape(1, H, DK)], axis=-1).reshape(1, 3 * D)

    # all small vectors packed into a single (8, 128) operand
    vecs = jnp.concatenate(
        [_pad_row(bqkv), _pad_row(bo), _pad_row(a1), _pad_row(c1),
         _pad_row(a2), _pad_row(c2), _pad_row(b1), _pad_row(b2)], axis=0)

    # additive mask bias: 0 where keep, -1e9 where masked; repeated per head
    bias = (mask - 1.0) * 1e9               # (B, 1, S)
    bias_bh = jnp.repeat(bias, H, axis=0)   # (B*H, 1, S), n = b*H + h

    x2d = x.reshape(B * S, D)               # single contiguous token slab

    out = pl.pallas_call(
        encoder_layer_kernel,
        out_shape=jax.ShapeDtypeStruct((B * S, D), jnp.float32),
        # no grid: single invocation, whole operands resident in VMEM
        # (total weights + activations < 64 KiB on every TPU generation).
        input_output_aliases={0: 0},        # output reuses x2d's buffer
    )(x2d, bias_bh, wqkv, wo, w1, w2, vecs)
    return out.reshape(B, S, D)


def encoder_layer_ref(x, mask, params):
    """Pure-JAX reference mirroring the PyTorch forward (eval mode)."""
    (wq, bq, wk, bk, wv, bv, wo, bo,
     a1, c1, a2, c2, w1, b1, w2, b2) = params

    def ln(v, a, c):
        mean = jnp.mean(v, axis=-1, keepdims=True)
        var = jnp.sum((v - mean) ** 2, axis=-1, keepdims=True) / (v.shape[-1] - 1)
        return a * (v - mean) / (jnp.sqrt(var) + EPS) + c

    xn = ln(x, a1, c1)
    q = xn @ wq + bq
    k = xn @ wk + bk
    v = xn @ wv + bv
    qh = q.reshape(B, S, H, DK).transpose(0, 2, 1, 3)
    kh = k.reshape(B, S, H, DK).transpose(0, 2, 1, 3)
    vh = v.reshape(B, S, H, DK).transpose(0, 2, 1, 3)
    scores = jnp.einsum("bhqd,bhkd->bhqk", qh, kh) / jnp.sqrt(jnp.float32(DK))
    scores = jnp.where(mask[:, None, :, :] == 0.0, -1e9, scores)
    p = jax.nn.softmax(scores, axis=-1)
    o = jnp.einsum("bhqk,bhkd->bhqd", p, vh).transpose(0, 2, 1, 3).reshape(B, S, D)
    x1 = x + (o @ wo + bo)

    xn2 = ln(x1, a2, c2)
    ff = jnp.maximum(xn2 @ w1 + b1, 0.0) @ w2 + b2
    return x1 + ff


if __name__ == "__main__":
    key = jax.random.PRNGKey(0)
    keys = jax.random.split(key, 16)

    def w(k, shape, scale=0.1):
        return (scale * jax.random.normal(k, shape)).astype(jnp.float32)

    x = w(keys[0], (B, S, D), 1.0)
    # key mask: batch 0 keeps all keys, batch 1 keeps the first 5
    lengths = jnp.array([S, 5])
    mask = (jnp.arange(S)[None, :] < lengths[:, None]).astype(jnp.float32)
    mask = mask.reshape(B, 1, S)

    params = (
        w(keys[1], (D, D)), w(keys[2], (1, D)),      # wq, bq
        w(keys[3], (D, D)), w(keys[4], (1, D)),      # wk, bk
        w(keys[5], (D, D)), w(keys[6], (1, D)),      # wv, bv
        w(keys[7], (D, D)), w(keys[8], (1, D)),      # wo, bo
        jnp.ones((1, D), jnp.float32), jnp.zeros((1, D), jnp.float32),   # ln1
        jnp.ones((1, D), jnp.float32), jnp.zeros((1, D), jnp.float32),   # ln2
        w(keys[9], (D, DFF)), w(keys[10], (1, DFF)),  # ffn w1, b1
        w(keys[11], (DFF, D)), w(keys[12], (1, D)),   # ffn w2, b2
    )

    out = jax.block_until_ready(encoder_layer(x, mask, params))
    ref = encoder_layer_ref(x, mask, params)
    assert out.shape == (B, S, D)
    err = float(jnp.max(jnp.abs(out - ref)))
    # tolerance mildly relaxed vs. exact-divide: softmax denominator uses the
    # EUP approximate reciprocal (per perf feedback).
    assert jnp.allclose(out, ref, atol=2e-3, rtol=2e-3), err
    print("KERNEL_OK")
</pallas_src>

<mosaic_0001>
module attributes {stable_mosaic.version = 11 : i64} {
  func.func @encoder_layer_kernel(%arg0: memref<16x32xf32, #tpu.memory_space<vmem>>, %arg1: memref<8x1x8xf32, #tpu.memory_space<vmem>>, %arg2: memref<32x96xf32, #tpu.memory_space<vmem>>, %arg3: memref<32x32xf32, #tpu.memory_space<vmem>>, %arg4: memref<32x64xf32, #tpu.memory_space<vmem>>, %arg5: memref<64x32xf32, #tpu.memory_space<vmem>>, %arg6: memref<8x128xf32, #tpu.memory_space<vmem>>, %arg7: memref<16x32xf32, #tpu.memory_space<vmem>>) attributes {dimension_semantics = [], scalar_prefetch = 0 : i64, scratch_operands = 0 : i64, tpu.core_type = #tpu.core_type<tc>} {
    %c0 = arith.constant 0 : index
    %c0_0 = arith.constant 0 : index
    %0 = vector.load %arg0[%c0, %c0_0] : memref<16x32xf32, #tpu.memory_space<vmem>>, vector<16x32xf32>
    %c0_1 = arith.constant 0 : index
    %c0_2 = arith.constant 0 : index
    %1 = vector.load %arg6[%c0_1, %c0_2] : memref<8x128xf32, #tpu.memory_space<vmem>>, vector<8x128xf32>
    %2 = vector.extract_strided_slice %1 {offsets = [0, 0], sizes = [1, 96], strides = [1, 1]} : vector<8x128xf32> to vector<1x96xf32>
    %3 = vector.extract_strided_slice %1 {offsets = [1, 0], sizes = [1, 32], strides = [1, 1]} : vector<8x128xf32> to vector<1x32xf32>
    %4 = vector.extract_strided_slice %1 {offsets = [2, 0], sizes = [1, 32], strides = [1, 1]} : vector<8x128xf32> to vector<1x32xf32>
    %5 = vector.extract_strided_slice %1 {offsets = [3, 0], sizes = [1, 32], strides = [1, 1]} : vector<8x128xf32> to vector<1x32xf32>
    %6 = vector.extract_strided_slice %1 {offsets = [4, 0], sizes = [1, 32], strides = [1, 1]} : vector<8x128xf32> to vector<1x32xf32>
    %7 = vector.extract_strided_slice %1 {offsets = [5, 0], sizes = [1, 32], strides = [1, 1]} : vector<8x128xf32> to vector<1x32xf32>
    %8 = vector.extract_strided_slice %1 {offsets = [6, 0], sizes = [1, 64], strides = [1, 1]} : vector<8x128xf32> to vector<1x64xf32>
    %9 = vector.extract_strided_slice %1 {offsets = [7, 0], sizes = [1, 32], strides = [1, 1]} : vector<8x128xf32> to vector<1x32xf32>
    %cst = arith.constant dense<0.000000e+00> : vector<16xf32>
    %10 = vector.multi_reduction <add>, %0, %cst [1] : vector<16x32xf32> to vector<16xf32>
    %11 = vector.shape_cast %10 : vector<16xf32> to vector<16x1xf32>
    %cst_3 = arith.constant 3.200000e+01 : f32
    %12 = vector.broadcast %cst_3 : f32 to vector<16x1xf32>
    %13 = arith.divf %11, %12 : vector<16x1xf32>
    %14 = vector.broadcast %13 : vector<16x1xf32> to vector<16x32xf32>
    %15 = arith.subf %0, %14 : vector<16x32xf32>
    %16 = arith.mulf %15, %15 : vector<16x32xf32>
    %cst_4 = arith.constant dense<0.000000e+00> : vector<16xf32>
    %17 = vector.multi_reduction <add>, %16, %cst_4 [1] : vector<16x32xf32> to vector<16xf32>
    %18 = vector.shape_cast %17 : vector<16xf32> to vector<16x1xf32>
    %cst_5 = arith.constant 3.100000e+01 : f32
    %19 = vector.broadcast %cst_5 : f32 to vector<16x1xf32>
    %20 = arith.divf %18, %19 : vector<16x1xf32>
    %21 = vector.broadcast %13 : vector<16x1xf32> to vector<16x32xf32>
    %22 = arith.subf %0, %21 : vector<16x32xf32>
    %23 = vector.broadcast %4 : vector<1x32xf32> to vector<16x32xf32>
    %24 = arith.mulf %23, %22 : vector<16x32xf32>
    %25 = math.sqrt %20 : vector<16x1xf32>
    %cst_6 = arith.constant 9.99999997E-7 : f32
    %26 = vector.broadcast %cst_6 : f32 to vector<16x1xf32>
    %27 = arith.addf %25, %26 : vector<16x1xf32>
    %28 = vector.broadcast %27 : vector<16x1xf32> to vector<16x32xf32>
    %29 = arith.divf %24, %28 : vector<16x32xf32>
    %30 = vector.broadcast %5 : vector<1x32xf32> to vector<16x32xf32>
    %31 = arith.addf %29, %30 : vector<16x32xf32>
    %c0_7 = arith.constant 0 : index
    %c0_8 = arith.constant 0 : index
    %32 = vector.load %arg2[%c0_7, %c0_8] : memref<32x96xf32, #tpu.memory_space<vmem>>, vector<32x96xf32>
    %cst_9 = arith.constant dense<0.000000e+00> : vector<16x96xf32>
    %33 = tpu.matmul %31, %32, %cst_9 {dimension_numbers = #tpu.dot_dimension_numbers<[1], [0], [0], [1], [0, 0, 1, 1], [], []>} : vector<16x32xf32>, vector<32x96xf32>, vector<16x96xf32> -> vector<16x96xf32>
    %34 = vector.broadcast %2 : vector<1x96xf32> to vector<16x96xf32>
    %35 = arith.addf %33, %34 : vector<16x96xf32>
    %36 = vector.extract_strided_slice %35 {offsets = [0, 0], sizes = [8, 24], strides = [1, 1]} : vector<16x96xf32> to vector<8x24xf32>
    %37 = vector.extract_strided_slice %35 {offsets = [0, 24], sizes = [8, 24], strides = [1, 1]} : vector<16x96xf32> to vector<8x24xf32>
    %38 = vector.extract_strided_slice %35 {offsets = [0, 48], sizes = [8, 24], strides = [1, 1]} : vector<16x96xf32> to vector<8x24xf32>
    %39 = vector.extract_strided_slice %35 {offsets = [0, 72], sizes = [8, 24], strides = [1, 1]} : vector<16x96xf32> to vector<8x24xf32>
    %40 = vector.extract_strided_slice %35 {offsets = [8, 0], sizes = [8, 24], strides = [1, 1]} : vector<16x96xf32> to vector<8x24xf32>
    %41 = vector.extract_strided_slice %35 {offsets = [8, 24], sizes = [8, 24], strides = [1, 1]} : vector<16x96xf32> to vector<8x24xf32>
    %42 = vector.extract_strided_slice %35 {offsets = [8, 48], sizes = [8, 24], strides = [1, 1]} : vector<16x96xf32> to vector<8x24xf32>
    %43 = vector.extract_strided_slice %35 {offsets = [8, 72], sizes = [8, 24], strides = [1, 1]} : vector<16x96xf32> to vector<8x24xf32>
    %44 = vector.shape_cast %36 : vector<8x24xf32> to vector<1x8x24xf32>
    %45 = vector.shape_cast %37 : vector<8x24xf32> to vector<1x8x24xf32>
    %46 = vector.shape_cast %38 : vector<8x24xf32> to vector<1x8x24xf32>
    %47 = vector.shape_cast %39 : vector<8x24xf32> to vector<1x8x24xf32>
    %48 = vector.shape_cast %40 : vector<8x24xf32> to vector<1x8x24xf32>
    %49 = vector.shape_cast %41 : vector<8x24xf32> to vector<1x8x24xf32>
    %50 = vector.shape_cast %42 : vector<8x24xf32> to vector<1x8x24xf32>
    %51 = vector.shape_cast %43 : vector<8x24xf32> to vector<1x8x24xf32>
    %52 = tpu.concatenate %44, %45, %46, %47, %48, %49, %50, %51 in 0 : vector<1x8x24xf32>, vector<1x8x24xf32>, vector<1x8x24xf32>, vector<1x8x24xf32>, vector<1x8x24xf32>, vector<1x8x24xf32>, vector<1x8x24xf32>, vector<1x8x24xf32> -> vector<8x8x24xf32>
    %53 = vector.extract_strided_slice %52 {offsets = [0, 0, 0], sizes = [8, 8, 8], strides = [1, 1, 1]} : vector<8x8x24xf32> to vector<8x8x8xf32>
    %54 = vector.extract_strided_slice %52 {offsets = [0, 0, 8], sizes = [8, 8, 8], strides = [1, 1, 1]} : vector<8x8x24xf32> to vector<8x8x8xf32>
    %55 = vector.extract_strided_slice %52 {offsets = [0, 0, 16], sizes = [8, 8, 8], strides = [1, 1, 1]} : vector<8x8x24xf32> to vector<8x8x8xf32>
    "tpu.trace_start"() <{level = 10 : i32, message = "nqd,nkd->nqk"}> : () -> ()
    %cst_10 = arith.constant dense<0.000000e+00> : vector<8x8x8xf32>
    %56 = tpu.matmul %53, %54, %cst_10 {dimension_numbers = #tpu.dot_dimension_numbers<[2], [2], [1], [1], [0, 0, 0, 1, 1, 1], [0], [0]>} : vector<8x8x8xf32>, vector<8x8x8xf32>, vector<8x8x8xf32> -> vector<8x8x8xf32>
    "tpu.trace_stop"() : () -> ()
    %cst_11 = arith.constant 0.353553385 : f32
    %57 = vector.broadcast %cst_11 : f32 to vector<8x8x8xf32>
    %58 = arith.mulf %56, %57 : vector<8x8x8xf32>
    %c0_12 = arith.constant 0 : index
    %c0_13 = arith.constant 0 : index
    %c0_14 = arith.constant 0 : index
    %59 = vector.load %arg1[%c0_12, %c0_13, %c0_14] : memref<8x1x8xf32, #tpu.memory_space<vmem>>, vector<8x1x8xf32>
    %60 = vector.broadcast %59 : vector<8x1x8xf32> to vector<8x8x8xf32>
    %61 = arith.addf %58, %60 : vector<8x8x8xf32>
    %cst_15 = arith.constant dense<0xFF800000> : vector<8x8xf32>
    %62 = vector.multi_reduction <maximumf>, %61, %cst_15 [2] : vector<8x8x8xf32> to vector<8x8xf32>
    %63 = vector.shape_cast %62 : vector<8x8xf32> to vector<8x8x1xf32>
    %64 = vector.broadcast %63 : vector<8x8x1xf32> to vector<8x8x8xf32>
    %65 = arith.subf %61, %64 : vector<8x8x8xf32>
    %66 = math.exp %65 : vector<8x8x8xf32>
    %cst_16 = arith.constant dense<0.000000e+00> : vector<8x8xf32>
    %67 = vector.multi_reduction <add>, %66, %cst_16 [2] : vector<8x8x8xf32> to vector<8x8xf32>
    %68 = vector.shape_cast %67 : vector<8x8xf32> to vector<8x8x1xf32>
    %69 = tpu.reciprocal %68 {approx = true} : vector<8x8x1xf32> -> vector<8x8x1xf32>
    %70 = vector.broadcast %69 : vector<8x8x1xf32> to vector<8x8x8xf32>
    %71 = arith.mulf %66, %70 : vector<8x8x8xf32>
    "tpu.trace_start"() <{level = 10 : i32, message = "nqk,nkd->nqd"}> : () -> ()
    %cst_17 = arith.constant dense<0.000000e+00> : vector<8x8x8xf32>
    %72 = tpu.matmul %71, %55, %cst_17 {dimension_numbers = #tpu.dot_dimension_numbers<[2], [1], [1], [2], [0, 0, 0, 1, 1, 2], [0], [0]>} : vector<8x8x8xf32>, vector<8x8x8xf32>, vector<8x8x8xf32> -> vector<8x8x8xf32>
    "tpu.trace_stop"() : () -> ()
    %73 = vector.extract_strided_slice %72 {offsets = [0, 0, 0], sizes = [1, 8, 8], strides = [1, 1, 1]} : vector<8x8x8xf32> to vector<1x8x8xf32>
    %74 = vector.shape_cast %73 : vector<1x8x8xf32> to vector<8x8xf32>
    %75 = vector.extract_strided_slice %72 {offsets = [1, 0, 0], sizes = [1, 8, 8], strides = [1, 1, 1]} : vector<8x8x8xf32> to vector<1x8x8xf32>
    %76 = vector.shape_cast %75 : vector<1x8x8xf32> to vector<8x8xf32>
    %77 = vector.extract_strided_slice %72 {offsets = [2, 0, 0], sizes = [1, 8, 8], strides = [1, 1, 1]} : vector<8x8x8xf32> to vector<1x8x8xf32>
    %78 = vector.shape_cast %77 : vector<1x8x8xf32> to vector<8x8xf32>
    %79 = vector.extract_strided_slice %72 {offsets = [3, 0, 0], sizes = [1, 8, 8], strides = [1, 1, 1]} : vector<8x8x8xf32> to vector<1x8x8xf32>
    %80 = vector.shape_cast %79 : vector<1x8x8xf32> to vector<8x8xf32>
    %81 = tpu.concatenate %74, %76, %78, %80 in 1 : vector<8x8xf32>, vector<8x8xf32>, vector<8x8xf32>, vector<8x8xf32> -> vector<8x32xf32>
    %82 = vector.extract_strided_slice %72 {offsets = [4, 0, 0], sizes = [1, 8, 8], strides = [1, 1, 1]} : vector<8x8x8xf32> to vector<1x8x8xf32>
    %83 = vector.shape_cast %82 : vector<1x8x8xf32> to vector<8x8xf32>
    %84 = vector.extract_strided_slice %72 {offsets = [5, 0, 0], sizes = [1, 8, 8], strides = [1, 1, 1]} : vector<8x8x8xf32> to vector<1x8x8xf32>
    %85 = vector.shape_cast %84 : vector<1x8x8xf32> to vector<8x8xf32>
    %86 = vector.extract_strided_slice %72 {offsets = [6, 0, 0], sizes = [1, 8, 8], strides = [1, 1, 1]} : vector<8x8x8xf32> to vector<1x8x8xf32>
    %87 = vector.shape_cast %86 : vector<1x8x8xf32> to vector<8x8xf32>
    %88 = vector.extract_strided_slice %72 {offsets = [7, 0, 0], sizes = [1, 8, 8], strides = [1, 1, 1]} : vector<8x8x8xf32> to vector<1x8x8xf32>
    %89 = vector.shape_cast %88 : vector<1x8x8xf32> to vector<8x8xf32>
    %90 = tpu.concatenate %83, %85, %87, %89 in 1 : vector<8x8xf32>, vector<8x8xf32>, vector<8x8xf32>, vector<8x8xf32> -> vector<8x32xf32>
    %91 = tpu.concatenate %81, %90 in 0 : vector<8x32xf32>, vector<8x32xf32> -> vector<16x32xf32>
    %c0_18 = arith.constant 0 : index
    %c0_19 = arith.constant 0 : index
    %92 = vector.load %arg3[%c0_18, %c0_19] : memref<32x32xf32, #tpu.memory_space<vmem>>, vector<32x32xf32>
    %cst_20 = arith.constant dense<0.000000e+00> : vector<16x32xf32>
    %93 = tpu.matmul %91, %92, %cst_20 {dimension_numbers = #tpu.dot_dimension_numbers<[1], [0], [0], [1], [0, 0, 1, 1], [], []>} : vector<16x32xf32>, vector<32x32xf32>, vector<16x32xf32> -> vector<16x32xf32>
    %94 = vector.broadcast %3 : vector<1x32xf32> to vector<16x32xf32>
    %95 = arith.addf %93, %94 : vector<16x32xf32>
    %96 = arith.addf %0, %95 : vector<16x32xf32>
    %cst_21 = arith.constant dense<0.000000e+00> : vector<16xf32>
    %97 = vector.multi_reduction <add>, %96, %cst_21 [1] : vector<16x32xf32> to vector<16xf32>
    %98 = vector.shape_cast %97 : vector<16xf32> to vector<16x1xf32>
    %cst_22 = arith.constant 3.200000e+01 : f32
    %99 = vector.broadcast %cst_22 : f32 to vector<16x1xf32>
    %100 = arith.divf %98, %99 : vector<16x1xf32>
    %101 = vector.broadcast %100 : vector<16x1xf32> to vector<16x32xf32>
    %102 = arith.subf %96, %101 : vector<16x32xf32>
    %103 = arith.mulf %102, %102 : vector<16x32xf32>
    %cst_23 = arith.constant dense<0.000000e+00> : vector<16xf32>
    %104 = vector.multi_reduction <add>, %103, %cst_23 [1] : vector<16x32xf32> to vector<16xf32>
    %105 = vector.shape_cast %104 : vector<16xf32> to vector<16x1xf32>
    %cst_24 = arith.constant 3.100000e+01 : f32
    %106 = vector.broadcast %cst_24 : f32 to vector<16x1xf32>
    %107 = arith.divf %105, %106 : vector<16x1xf32>
    %108 = vector.broadcast %100 : vector<16x1xf32> to vector<16x32xf32>
    %109 = arith.subf %96, %108 : vector<16x32xf32>
    %110 = vector.broadcast %6 : vector<1x32xf32> to vector<16x32xf32>
    %111 = arith.mulf %110, %109 : vector<16x32xf32>
    %112 = math.sqrt %107 : vector<16x1xf32>
    %cst_25 = arith.constant 9.99999997E-7 : f32
    %113 = vector.broadcast %cst_25 : f32 to vector<16x1xf32>
    %114 = arith.addf %112, %113 : vector<16x1xf32>
    %115 = vector.broadcast %114 : vector<16x1xf32> to vector<16x32xf32>
    %116 = arith.divf %111, %115 : vector<16x32xf32>
    %117 = vector.broadcast %7 : vector<1x32xf32> to vector<16x32xf32>
    %118 = arith.addf %116, %117 : vector<16x32xf32>
    %c0_26 = arith.constant 0 : index
    %c0_27 = arith.constant 0 : index
    %119 = vector.load %arg4[%c0_26, %c0_27] : memref<32x64xf32, #tpu.memory_space<vmem>>, vector<32x64xf32>
    %cst_28 = arith.constant dense<0.000000e+00> : vector<16x64xf32>
    %120 = tpu.matmul %118, %119, %cst_28 {dimension_numbers = #tpu.dot_dimension_numbers<[1], [0], [0], [1], [0, 0, 1, 1], [], []>} : vector<16x32xf32>, vector<32x64xf32>, vector<16x64xf32> -> vector<16x64xf32>
    %121 = vector.broadcast %8 : vector<1x64xf32> to vector<16x64xf32>
    %122 = arith.addf %120, %121 : vector<16x64xf32>
    %cst_29 = arith.constant 0.000000e+00 : f32
    %123 = vector.broadcast %cst_29 : f32 to vector<16x64xf32>
    %124 = arith.maximumf %122, %123 : vector<16x64xf32>
    %c0_30 = arith.constant 0 : index
    %c0_31 = arith.constant 0 : index
    %125 = vector.load %arg5[%c0_30, %c0_31] : memref<64x32xf32, #tpu.memory_space<vmem>>, vector<64x32xf32>
    %cst_32 = arith.constant dense<0.000000e+00> : vector<16x32xf32>
    %126 = tpu.matmul %124, %125, %cst_32 {dimension_numbers = #tpu.dot_dimension_numbers<[1], [0], [0], [1], [0, 0, 1, 1], [], []>} : vector<16x64xf32>, vector<64x32xf32>, vector<16x32xf32> -> vector<16x32xf32>
    %127 = vector.broadcast %9 : vector<1x32xf32> to vector<16x32xf32>
    %128 = arith.addf %126, %127 : vector<16x32xf32>
    %129 = arith.addf %96, %128 : vector<16x32xf32>
    %c0_33 = arith.constant 0 : index
    %c0_34 = arith.constant 0 : index
    %130 = vector.load %arg7[%c0_33, %c0_34] : memref<16x32xf32, #tpu.memory_space<vmem>>, vector<16x32xf32>
    tpu.vector_store %arg7[%c0_33, %c0_34], %129 {strides = array<i32>} : memref<16x32xf32, #tpu.memory_space<vmem>>, vector<16x32xf32>,
    return
  }
}

</mosaic_0001>

<bundles_post_ra>
// kernel: encoder_layer.1
= control target key start
LH: loop header
LB: loop body
LE: loop exit
PB: predicated region body
PF: predicated region fallthrough
CT: control target
= control target key end

     0   :  { %vm29_vm0 = vcmask 261120   ;;  %v52_v25 = vlaneseq  ;;  %v2262_v52 = vmov 0.0   ;;  %vm2263_vm5 = vmmov 0   ;;  %s2265_s13 = smov 104   ;;  %s2266_s14 = smov 56   ;;  %s2628_s0 = inlined_call_operand.vmem [shape: f32[16,32], index: 0, kind: input, shape index: {}, may-alias: {0,7}]   ;;  %s2629_s2 = inlined_call_operand.vmem [shape: f32[32,96], index: 2, kind: input, shape index: {}]   ;;  %s2630_s6 = inlined_call_operand.vmem [shape: f32[8,128], index: 6, kind: input, shape index: {}]   ;;  %s2631_s1 = inlined_call_operand.vmem [shape: f32[8,1,8], index: 1, kind: input, shape index: {}]   ;;  %s2632_s3 = inlined_call_operand.vmem [shape: f32[32,32], index: 3, kind: input, shape index: {}]   ;;  %s2633_s4 = inlined_call_operand.vmem [shape: f32[32,64], index: 4, kind: input, shape index: {}]   ;;  %s2634_s5 = inlined_call_operand.vmem [shape: f32[64,32], index: 5, kind: input, shape index: {}]   ;;  %s2635_s7 = inlined_call_operand.vmem [shape: f32[16,32], index: 7, kind: output, shape index: {}, may-alias: {0,7}]  }
   0x1   :  { %v2315_v0 = vld [vmem:[%s2628_s0] sm:$0xff]  ;;  %v2320_v1 = vld [vmem:[%s2628_s0 + $0x8] sm:$0xff]  ;;  %v86_v16 = vld [vmem:[%s2629_s2 + $0x10] sm:$0xff]  ;;  %2053 = vmatprep.subr.mxu0 %v2262_v52  ;;  %2055 = vmatprep.mubr.msk.f32.mxu0 %vm2263_vm5, %v2262_v52  ;;  %s2267_s15 = smov 120   ;;  %vm189_vm6 = vcmask 64512   ;;  %s2268_s8 = smov 112  }
   0x2   :  { %v30_v2 = vsel %vm29_vm0, %v2315_v0, 0.0  ;;  %v33_v3 = vsel %vm29_vm0, %v2320_v1, 0.0  ;;  %v84_v14 = vld [vmem:[%s2629_s2] sm:$0xff]  ;;  %v85_v15 = vld [vmem:[%s2629_s2 + $0x8] sm:$0xff]  ;;  %v87_v18 = vld [vmem:[%s2629_s2 + $0x18] sm:$0xff]  ;;  %v2342_v30 = vshrl.u32 %v52_v25, 7 }
   0x3   :  { %31 = vadd.xlane.f32.xlu0 %v30_v2  ;;  %v2164_v17 = vpack.c.bf16 %v85_v15, %v84_v14  ;;  %v2168_v19 = vpack.c.bf16 %v87_v18, %v86_v16  ;;  %v2348_v38 = vld [vmem:[%s2630_s6] sm:$0xff]  ;;  %s2264_s6 = smov 80   ;;  %s2271_s16 = smov 24   ;;  %vm1577_vm7 = vcmask 130048   ;;  %vm1579_vm8 = vcmask 195584  }
   0x4   :  { %v54_v36 = vsub.s32 2, %v2342_v30  ;;  %v80_v41 = vsub.s32 3, %v2342_v30  ;;  %v90_v51 = vsub.s32 0, %v2342_v30  ;;  %v1951_v18 = vld [vmem:[%s2631_s1 + $0x1] ss:$0 sm:$0xff]  ;;  %vm1842_vm13 = vcmask 523264  }
   0x5   :  { %2165 = vmatprep.subr.bf16.mxu1 %v2164_v17 }
   0x6   :  { %2167 = vmatpush3.bf16.msra.mxu1 %v2164_v17  ;;  %v55_v40 = vrot.slane %v2348_v38, %v54_v36  ;;  %v81_v43 = vrot.slane %v2348_v38, %v80_v41  ;;  %v91_v53 = vrot.slane %v2348_v38, %v90_v51  ;;  %v1955_v41 = vld [vmem:[%s2631_s1 + $0x5] ss:$0 sm:$0xff]  ;;  %v1957_v51 = vld [vmem:[%s2631_s1 + $0x7] ss:$0 sm:$0xff] }
   0x7   :  { %34 = vadd.xlane.f32.xlu0 %v33_v3  ;;  %2169 = vmatprep.subr.bf16.mxu1 %v2168_v19 }
   0xa   :  { %2171 = vmatpush3.bf16.msra.mxu1 %v2168_v19  ;;  %v1952_v19 = vld [vmem:[%s2631_s1 + $0x2] ss:$0 sm:$0xff] }
   0xb   :  { %2043 = vmatprep.subr.mxu1 %v2262_v52 }
  0x90   :  { %v32_v4 = vpop.xlane.xlu0 %31 }
  0x91   :  { %v37_v5 = vmul.f32 0.03125, %v32_v4 }
  0x93   :  { %v39_v6 = vsub.f32 %v2315_v0, %v37_v5 }
  0x94   :  { %v35_v7 = vpop.xlane.xlu0 %34 }
  0x95   :  { %v38_v8 = vmul.f32 0.03125, %v35_v7  ;;  %v41_v9 = vmul.f32 %v39_v6, %v39_v6  ;;  %v56_v42 = vmul.f32 %v55_v40, %v39_v6 }
  0x97   :  { %v40_v10 = vsub.f32 %v2320_v1, %v38_v8  ;;  %v43_v11 = vsel %vm29_vm0, %v41_v9, 0.0 }
  0x98   :  { %44 = vadd.xlane.f32.xlu1 %v43_v11  ;;  %v1950_v11 = vld [vmem:[%s2631_s1] ss:$0 sm:$0xff] }
  0x99   :  { %v42_v12 = vmul.f32 %v40_v10, %v40_v10  ;;  %v57_v46 = vmul.f32 %v55_v40, %v40_v10 }
  0x9b   :  { %v46_v13 = vsel %vm29_vm0, %v42_v12, 0.0 }
  0x9c   :  { %47 = vadd.xlane.f32.xlu1 %v46_v13 }
 0x125   :  { %v45_v20 = vpop.xlane.xlu1 %44 }
 0x126   :  { %v50_v21 = vmul.f32 0.032258064, %v45_v20 }
 0x128   :  { %2214 = vrsqrt.f32 %v50_v21  ;;  %vm60_vm1 = vcmp.eq.f32.partialorder %v50_v21, inf  ;;  %v63_v27 = vand.u32 2147483648, %v50_v21  ;;  %vm62_vm2 = vcmp.eq.f32.partialorder %v50_v21, 0.0 }
 0x129   :  { %v48_v22 = vpop.xlane.xlu1 %47 }
 0x12a   :  { %v51_v23 = vmul.f32 0.032258064, %v48_v22 }
 0x12c   :  { %2216 = vrsqrt.f32 %v51_v23  ;;  %vm67_vm3 = vcmp.eq.f32.partialorder %v51_v23, inf  ;;  %v70_v34 = vand.u32 2147483648, %v51_v23  ;;  %vm69_vm4 = vcmp.eq.f32.partialorder %v51_v23, 0.0 }
 0x132   :  { %v2215_v24 = vpop.eup %2214 }
 0x133   :  { %v59_v26 = vmul.f32 %v2215_v24, %v50_v21 }
 0x135   :  { %v61_v28 = vsel %vm60_vm1, %v50_v21, %v59_v26 }
 0x136   :  { %v2217_v29 = vpop.eup %2216  ;;  %v64_v31 = vsel %vm62_vm2, %v63_v27, %v61_v28  ;;  %v1953_v28 = vld [vmem:[%s2631_s1 + $0x3] ss:$0 sm:$0xff] }
 0x137   :  { %v66_v32 = vmul.f32 %v2217_v29, %v51_v23  ;;  %v72_v33 = vadd.f32 1e-06, %v64_v31 }
 0x139   :  { %v68_v35 = vsel %vm67_vm3, %v51_v23, %v66_v32  ;;  %2218 = vrcp.f32 %v72_v33 }
 0x13a   :  { %v71_v37 = vsel %vm69_vm4, %v70_v34, %v68_v35 }
 0x13b   :  { %v73_v39 = vadd.f32 1e-06, %v71_v37  ;;  %v1954_v37 = vld [vmem:[%s2631_s1 + $0x4] ss:$0 sm:$0xff] }
 0x13d   :  { %2220 = vrcp.f32 %v73_v39 }
 0x143   :  { %v2219_v44 = vpop.eup %2218 }
 0x144   :  { %v75_v45 = vmul.f32 %v2219_v44, %v56_v42 }
 0x146   :  { %v82_v47 = vadd.f32 %v81_v43, %v75_v45 }
 0x147   :  { %v2221_v48 = vpop.eup %2220 }
 0x148   :  { %v77_v49 = vmul.f32 %v2221_v48, %v57_v46  ;;  %2040 = vmatprep.mubr.msk.f32.mxu1 %vm29_vm0, %v82_v47 }
 0x14a   :  { %v83_v50 = vadd.f32 %v81_v43, %v77_v49  ;;  %v1956_v49 = vld [vmem:[%s2631_s1 + $0x6] ss:$0 sm:$0xff] }
 0x14c   :  { %2041 = vmatmul.mubr.msk.f32.vlgmr.msra.gmra.mrb[0].mxu1 %vm29_vm0, %v83_v50 }
 0x14d   :  { %2045 = vmatprep.mubr.msk.f32.mxu1 %vm2263_vm5, %v2262_v52 }
 0x21f   :  { %v2042_v54 = vpop.f32.mrb[0].mxu1 }
 0x220   :  { %v164_v55 = vpop.f32.mrb[1].mxu1  ;;  %v2367_v57 = vadd.f32 %v2042_v54, %v91_v53 }
 0x221   :  { %v2363_v56 = vadd.f32 %v164_v55, %v91_v53 }
 0x223   :  { %176 = vrot.lane.b32.xlu1 %v2363_v56, %s2264_s6  ;;  %174 = vrot.lane.b32.xlu0 %v2363_v56, %s2265_s13 }
 0x227   :  { %178 = vrot.lane.b32.xlu1 %v2363_v56, %s2266_s14  ;;  %183 = vrot.lane.b32.xlu0 %v2367_v57, %s2264_s6 }
 0x22b   :  { %181 = vrot.lane.b32.xlu1 %v2367_v57, %s2265_s13  ;;  %187 = vrot.lane.b32.xlu0 %v2363_v56, %s2267_s15 }
 0x22f   :  { %185 = vrot.lane.b32.xlu1 %v2367_v57, %s2266_s14  ;;  %s2269_s14 = smov 8  }
 0x295   :  { %v2374_v58 = vpop.permute.xlu1 %176  ;;  %v2376_v59 = vpop.permute.xlu0 %174 }
 0x296   :  { %340 = vrot.lane.b32.xlu0 %v2374_v58, %s2267_s15  ;;  %264 = vrot.lane.b32.xlu1 %v2376_v59, %s2267_s15 }
 0x299   :  { %v2380_v60 = vpop.permute.xlu1 %178  ;;  %v2382_v61 = vpop.permute.xlu0 %183 }
 0x29a   :  { %492 = vrot.lane.b32.xlu0 %v2367_v57, %s2267_s15  ;;  %416 = vrot.lane.b32.xlu1 %v2380_v60, %s2267_s15 }
 0x29d   :  { %v2386_v62 = vpop.permute.xlu1 %181  ;;  %v188_v63 = vpop.permute.xlu0 %187 }
 0x29e   :  { %568 = vrot.lane.b32.xlu1 %v2386_v62, %s2267_s15  ;;  %644 = vrot.lane.b32.xlu0 %v2382_v61, %s2267_s15 }
 0x29f   :  { %2044 = vmatpush3.xpose.msk.msra.mxu1 %vm189_vm6, %v188_v63 }
 0x2a0   :  { %2048 = vmatprep.subr.mxu1 %v2262_v52 }
 0x2a1   :  { %v2392_v2 = vpop.permute.xlu1 %185 }
 0x2a2   :  { %2046 = vmatmul.mubr.msk.f32.vlgmr.msra.gmra.mrb[2].mxu1 %vm189_vm6, %v2363_v56  ;;  %720 = vrot.lane.b32.xlu1 %v2392_v2, %s2267_s15  ;;  %s2270_s15 = smov 16  }
 0x2a3   :  { %2050 = vmatprep.mubr.msk.f32.mxu1 %vm2263_vm5, %v2262_v52 }
 0x308   :  { %v265_v3 = vpop.permute.xlu1 %264  ;;  %v341_v4 = vpop.permute.xlu0 %340 }
 0x309   :  { %2049 = vmatpush3.xpose.msk.msra.mxu1 %vm189_vm6, %v265_v3  ;;  %2054 = vmatpush3.xpose.msk.msra.mxu0 %vm189_vm6, %v341_v4 }
 0x30a   :  { %2058 = vmatprep.subr.mxu1 %v2262_v52  ;;  %2063 = vmatprep.subr.mxu0 %v2262_v52 }
 0x30c   :  { %v417_v5 = vpop.permute.xlu1 %416  ;;  %2051 = vmatmul.mubr.msk.f32.vlgmr.msra.gmra.mrb[4].mxu1 %vm189_vm6, %v2376_v59  ;;  %2056 = vmatmul.mubr.msk.f32.vlgmr.msra.gmra.mrb[0].mxu0 %vm189_vm6, %v2374_v58  ;;  %v493_v6 = vpop.permute.xlu0 %492 }
 0x30d   :  { %2059 = vmatpush3.xpose.msk.msra.mxu1 %vm189_vm6, %v417_v5  ;;  %2064 = vmatpush3.xpose.msk.msra.mxu0 %vm189_vm6, %v493_v6 }
 0x30e   :  { %2060 = vmatprep.mubr.msk.f32.mxu1 %vm2263_vm5, %v2262_v52  ;;  %2065 = vmatprep.mubr.msk.f32.mxu0 %vm2263_vm5, %v2262_v52 }
 0x30f   :  { %2068 = vmatprep.subr.mxu1 %v2262_v52  ;;  %2073 = vmatprep.subr.mxu0 %v2262_v52 }
 0x310   :  { %v569_v7 = vpop.permute.xlu1 %568  ;;  %2061 = vmatmul.mubr.msk.f32.vlgmr.msra.gmra.mrb[6].mxu1 %vm189_vm6, %v2380_v60  ;;  %2066 = vmatmul.mubr.msk.f32.vlgmr.msra.gmra.mrb[2].mxu0 %vm189_vm6, %v2367_v57  ;;  %v645_v8 = vpop.permute.xlu0 %644 }
 0x311   :  { %2069 = vmatpush3.xpose.msk.msra.mxu1 %vm189_vm6, %v569_v7  ;;  %2074 = vmatpush3.xpose.msk.msra.mxu0 %vm189_vm6, %v645_v8 }
 0x312   :  { %2070 = vmatprep.mubr.msk.f32.mxu1 %vm2263_vm5, %v2262_v52  ;;  %2075 = vmatprep.mubr.msk.f32.mxu0 %vm2263_vm5, %v2262_v52 }
 0x313   :  { %2078 = vmatprep.subr.mxu1 %v2262_v52  ;;  %2083 = vmatprep.subr.mxu0 %v2262_v52 }
 0x314   :  { %v721_v9 = vpop.permute.xlu1 %720  ;;  %2071 = vmatmul.mubr.msk.f32.vlgmr.msra.gmra.mrb[8].mxu1 %vm189_vm6, %v2386_v62  ;;  %2076 = vmatmul.mubr.msk.f32.vlgmr.msra.gmra.mrb[4].mxu0 %vm189_vm6, %v2382_v61 }
 0x315   :  { %2079 = vmatpush3.xpose.msk.msra.mxu1 %vm189_vm6, %v721_v9  ;;  %2080 = vmatprep.mubr.msk.f32.mxu1 %vm2263_vm5, %v2262_v52 }
 0x316   :  { %2088 = vmatprep.subr.mxu1 %v2262_v52  ;;  %2085 = vmatprep.mubr.msk.f32.mxu0 %vm2263_vm5, %v2262_v52 }
 0x318   :  { %2081 = vmatmul.mubr.msk.f32.vlgmr.msra.gmra.mrb[10].mxu1 %vm189_vm6, %v2392_v2 }
 0x319   :  { %2090 = vmatprep.mubr.msk.f32.mxu1 %vm2263_vm5, %v2262_v52 }
 0x375   :  { %v260_v10 = vpop.f32.mrb[2].mxu1 }
 0x376   :  { %v796_v12 = vmul.f32 0.35355338, %v260_v10  ;;  %v2047_v13 = vpop.f32.mrb[3].mxu1 }
 0x378   :  { %v860_v14 = vadd.f32 %v1950_v11, %v796_v12 }
 0x37a   :  { %v868_v15 = vsel %vm189_vm6, %v860_v14, -inf }
 0x37b   :  { %869 = vmax.xlane.f32.xlu0 %v868_v15 }
 0x3df   :  { %v336_v16 = vpop.f32.mrb[4].mxu1  ;;  %v412_v17 = vpop.f32.mrb[0].mxu0 }
 0x3e0   :  { %v797_v20 = vmul.f32 0.35355338, %v336_v16  ;;  %v798_v21 = vmul.f32 0.35355338, %v412_v17  ;;  %v2052_v22 = vpop.f32.mrb[5].mxu1  ;;  %v2057_v23 = vpop.f32.mrb[1].mxu0 }
 0x3e2   :  { %v861_v24 = vadd.f32 %v1951_v18, %v797_v20  ;;  %v862_v25 = vadd.f32 %v1952_v19, %v798_v21 }
 0x3e3   :  { %v488_v26 = vpop.f32.mrb[6].mxu1  ;;  %v564_v27 = vpop.f32.mrb[2].mxu0 }
 0x3e4   :  { %v799_v29 = vmul.f32 0.35355338, %v488_v26  ;;  %v2062_v31 = vpop.f32.mrb[7].mxu1  ;;  %v2067_v32 = vpop.f32.mrb[3].mxu0  ;;  %v800_v33 = vmul.f32 0.35355338, %v564_v27 }
 0x3e5   :  { %v871_v34 = vsel %vm189_vm6, %v861_v24, -inf  ;;  %v874_v35 = vsel %vm189_vm6, %v862_v25, -inf }
 0x3e6   :  { %872 = vmax.xlane.f32.xlu1 %v871_v34  ;;  %875 = vmax.xlane.f32.xlu0 %v874_v35  ;;  %v863_v36 = vadd.f32 %v1953_v28, %v799_v29  ;;  %v864_v47 = vadd.f32 %v1954_v37, %v800_v33 }
 0x3e7   :  { %v640_v39 = vpop.f32.mrb[8].mxu1  ;;  %v716_v40 = vpop.f32.mrb[4].mxu0 }
 0x3e8   :  { %v801_v42 = vmul.f32 0.35355338, %v640_v39  ;;  %v2072_v43 = vpop.f32.mrb[9].mxu1  ;;  %v2077_v44 = vpop.f32.mrb[5].mxu0  ;;  %v802_v45 = vmul.f32 0.35355338, %v716_v40 }
 0x3e9   :  { %v877_v46 = vsel %vm189_vm6, %v863_v36, -inf  ;;  %v880_v63 = vsel %vm189_vm6, %v864_v47, -inf }
 0x3ea   :  { %878 = vmax.xlane.f32.xlu0 %v877_v46  ;;  %v865_v48 = vadd.f32 %v1955_v41, %v801_v42  ;;  %v866_v3 = vadd.f32 %v1956_v49, %v802_v45 }
 0x3eb   :  { %v792_v50 = vpop.f32.mrb[10].mxu1 }
 0x3ec   :  { %v803_v53 = vmul.f32 0.35355338, %v792_v50  ;;  %v2082_v54 = vpop.f32.mrb[11].mxu1  ;;  %v883_v55 = vsel %vm189_vm6, %v865_v48, -inf  ;;  %v886_v6 = vsel %vm189_vm6, %v866_v3, -inf }
 0x3ed   :  { %884 = vmax.xlane.f32.xlu1 %v883_v55 }
 0x3ee   :  { %881 = vmax.xlane.f32.xlu0 %v880_v63  ;;  %v867_v4 = vadd.f32 %v1957_v51, %v803_v53 }
 0x3f0   :  { %v889_v5 = vsel %vm189_vm6, %v867_v4, -inf }
 0x3f1   :  { %890 = vmax.xlane.f32.xlu1 %v889_v5 }
 0x3f2   :  { %887 = vmax.xlane.f32.xlu0 %v886_v6 }
 0x402   :  { %1032 = vrot.lane.b32.xlu1 %v2376_v59, %s2268_s8 }
 0x406   :  { %1108 = vrot.lane.b32.xlu1 %v2374_v58, %s2268_s8 }
 0x408   :  { %956 = vrot.lane.b32.xlu0 %v2363_v56, %s2268_s8  ;;  %v870_v7 = vpop.xlane.xlu0 %869 }
 0x409   :  { %v892_v8 = vsub.f32 %v860_v14, %v870_v7 }
 0x40a   :  { %1184 = vrot.lane.b32.xlu1 %v2380_v60, %s2268_s8 }
 0x40b   :  { %v900_v9 = vmul.f32 1.442695, %v892_v8 }
 0x40c   :  { %1260 = vrot.lane.b32.xlu0 %v2367_v57, %s2268_s8 }
 0x40d   :  { %2222 = vpow2.f32 %v900_v9 }
 0x40e   :  { %1336 = vrot.lane.b32.xlu1 %v2386_v62, %s2268_s8 }
 0x417   :  { %v2485_v59 = vpop.eup %2222 }
 0x418   :  { %v916_v58 = vsel %vm189_vm6, %v2485_v59, 0.0 }
 0x42b   :  { %917 = vadd.xlane.f32.xlu0 %v916_v58 }
 0x473   :  { %v873_v56 = vpop.xlane.xlu1 %872  ;;  %v876_v10 = vpop.xlane.xlu0 %875 }
 0x474   :  { %v893_v11 = vsub.f32 %v861_v24, %v873_v56  ;;  %v894_v60 = vsub.f32 %v862_v25, %v876_v10 }
 0x476   :  { %v902_v12 = vmul.f32 1.442695, %v893_v11  ;;  %v904_v13 = vmul.f32 1.442695, %v894_v60 }
 0x477   :  { %v879_v57 = vpop.xlane.xlu0 %878 }
 0x478   :  { %2224 = vpow2.f32 %v902_v12  ;;  %v895_v15 = vsub.f32 %v863_v36, %v879_v57 }
 0x479   :  { %2226 = vpow2.f32 %v904_v13 }
 0x47a   :  { %v906_v62 = vmul.f32 1.442695, %v895_v15  ;;  %v885_v14 = vpop.xlane.xlu1 %884 }
 0x47b   :  { %v897_v16 = vsub.f32 %v865_v48, %v885_v14  ;;  %v882_v17 = vpop.xlane.xlu0 %881 }
 0x47c   :  { %2228 = vpow2.f32 %v906_v62  ;;  %v896_v18 = vsub.f32 %v864_v47, %v882_v17  ;;  %v1597_v17 = vld [vmem:[%s2632_s3 + $0x8] sm:$0xff] }
 0x47d   :  { %v910_v19 = vmul.f32 1.442695, %v897_v16  ;;  %v1596_v16 = vld [vmem:[%s2632_s3] sm:$0xff] }
 0x47e   :  { %v908_v20 = vmul.f32 1.442695, %v896_v18  ;;  %v891_v21 = vpop.xlane.xlu1 %890  ;;  %v2172_v18 = vpack.c.bf16 %v1597_v17, %v1596_v16  ;;  %v1833_v16 = vld [vmem:[%s2634_s5 + $0x18] sm:$0xff] }
 0x47f   :  { %2230 = vpow2.f32 %v910_v19  ;;  %v899_v22 = vsub.f32 %v867_v4, %v891_v21  ;;  %v888_v23 = vpop.xlane.xlu0 %887  ;;  %v1599_v19 = vld [vmem:[%s2632_s3 + $0x18] sm:$0xff] }
 0x480   :  { %2232 = vpow2.f32 %v908_v20  ;;  %v898_v24 = vsub.f32 %v866_v3, %v888_v23 }
 0x481   :  { %v914_v25 = vmul.f32 1.442695, %v899_v22 }
 0x482   :  { %v2225_v26 = vpop.eup %2224  ;;  %v912_v27 = vmul.f32 1.442695, %v898_v24  ;;  %v1033_v28 = vpop.permute.xlu1 %1032 }
 0x483   :  { %v2227_v29 = vpop.eup %2226  ;;  %2234 = vpow2.f32 %v914_v25  ;;  %v957_v31 = vpop.permute.xlu0 %956  ;;  %v919_v32 = vsel %vm189_vm6, %v2225_v26, 0.0  ;;  %2089 = vmatpush3.msra.mxu1 %v1033_v28 }
 0x484   :  { %2236 = vpow2.f32 %v912_v27  ;;  %920 = vadd.xlane.f32.xlu1 %v919_v32  ;;  %v922_v33 = vsel %vm189_vm6, %v2227_v29, 0.0  ;;  %2084 = vmatpush3.msra.mxu0 %v957_v31 }
 0x485   :  { %923 = vadd.xlane.f32.xlu0 %v922_v33  ;;  %2093 = vmatprep.subr.mxu0 %v2262_v52 }
 0x486   :  { %v2229_v34 = vpop.eup %2228  ;;  %2098 = vmatprep.subr.mxu1 %v2262_v52  ;;  %v1109_v49 = vpop.permute.xlu1 %1108 }
 0x487   :  { %v925_v35 = vsel %vm189_vm6, %v2229_v34, 0.0  ;;  %v1261_v45 = vpop.permute.xlu0 %1260 }
 0x488   :  { %926 = vadd.xlane.f32.xlu1 %v925_v35 }
 0x489   :  { %v2231_v36 = vpop.eup %2230 }
 0x48a   :  { %v2233_v37 = vpop.eup %2232  ;;  %v931_v39 = vsel %vm189_vm6, %v2231_v36, 0.0  ;;  %v1185_v50 = vpop.permute.xlu1 %1184 }
 0x48b   :  { %v928_v40 = vsel %vm189_vm6, %v2233_v37, 0.0 }
 0x48c   :  { %932 = vadd.xlane.f32.xlu1 %v931_v39  ;;  %929 = vadd.xlane.f32.xlu0 %v928_v40 }
 0x48d   :  { %v2496_v41 = vpop.eup %2234 }
 0x48e   :  { %v2498_v42 = vpop.eup %2236  ;;  %v937_v43 = vsel %vm189_vm6, %v2496_v41, 0.0 }
 0x48f   :  { %v934_v44 = vsel %vm189_vm6, %v2498_v42, 0.0 }
 0x490   :  { %938 = vadd.xlane.f32.xlu1 %v937_v43  ;;  %935 = vadd.xlane.f32.xlu0 %v934_v44 }
 0x4a1   :  { %1488 = vrot.lane.b32.xlu1 %v2392_v2, %s2268_s8  ;;  %v1337_v2 = vpop.permute.xlu1 %1336 }
 0x4a6   :  { %1412 = vrot.lane.b32.xlu0 %v2382_v61, %s2268_s8 }
 0x4b8   :  { %v918_v46 = vpop.xlane.xlu0 %917 }
 0x4b9   :  { %2238 = vrcp.f32 %v918_v46 }
 0x4c3   :  { %v2239_v47 = vpop.eup %2238 }
 0x4c4   :  { %v948_v48 = vmul.f32 %v2239_v47, %v2485_v59 }
 0x4c6   :  { %2086 = vmatmul.mubr.msk.f32.vlgmr.msra.gmra.mrb[6].mxu0 %vm189_vm6, %v948_v48 }
 0x4c7   :  { %2094 = vmatpush3.msra.mxu0 %v1109_v49  ;;  %2095 = vmatprep.mubr.msk.f32.mxu0 %vm2263_vm5, %v2262_v52  ;;  %v1602_v49 = vsub.s32 1, %v2342_v30 }
 0x4c8   :  { %2103 = vmatprep.subr.mxu0 %v2262_v52 }
 0x511   :  { %v921_v51 = vpop.xlane.xlu1 %920 }
 0x512   :  { %2240 = vrcp.f32 %v921_v51  ;;  %v924_v61 = vpop.xlane.xlu0 %923 }
 0x513   :  { %2242 = vrcp.f32 %v924_v61 }
 0x515   :  { %v927_v53 = vpop.xlane.xlu1 %926 }
 0x516   :  { %2244 = vrcp.f32 %v927_v53 }
 0x519   :  { %v933_v54 = vpop.xlane.xlu1 %932  ;;  %v930_v55 = vpop.xlane.xlu0 %929 }
 0x51a   :  { %2246 = vrcp.f32 %v933_v54 }
 0x51b   :  { %2248 = vrcp.f32 %v930_v55 }
 0x51c   :  { %v2241_v63 = vpop.eup %2240 }
 0x51d   :  { %v2243_v3 = vpop.eup %2242  ;;  %v949_v4 = vmul.f32 %v2241_v63, %v2225_v26  ;;  %v939_v5 = vpop.xlane.xlu1 %938 }
 0x51e   :  { %v936_v6 = vpop.xlane.xlu0 %935  ;;  %v950_v7 = vmul.f32 %v2243_v3, %v2227_v29  ;;  %2250 = vrcp.f32 %v939_v5 }
 0x51f   :  { %2252 = vrcp.f32 %v936_v6  ;;  %2091 = vmatmul.mubr.msk.f32.vlgmr.msra.gmra.mrb[12].mxu1 %vm189_vm6, %v949_v4 }
 0x520   :  { %v2245_v8 = vpop.eup %2244  ;;  %2096 = vmatmul.mubr.msk.f32.vlgmr.msra.gmra.mrb[8].mxu0 %vm189_vm6, %v950_v7  ;;  %2099 = vmatpush3.msra.mxu1 %v1185_v50  ;;  %v1603_v50 = vrot.slane %v2348_v38, %v1602_v49 }
 0x521   :  { %v951_v9 = vmul.f32 %v2245_v8, %v2229_v34  ;;  %2104 = vmatpush3.msra.mxu0 %v1261_v45  ;;  %2100 = vmatprep.mubr.msk.f32.mxu1 %vm2263_vm5, %v2262_v52  ;;  %v1489_v11 = vpop.permute.xlu1 %1488 }
 0x522   :  { %2108 = vmatprep.subr.mxu1 %v2262_v52  ;;  %2105 = vmatprep.mubr.msk.f32.mxu0 %vm2263_vm5, %v2262_v52  ;;  %v1413_v12 = vpop.permute.xlu0 %1412 }
 0x523   :  { %2101 = vmatmul.mubr.msk.f32.vlgmr.msra.gmra.mrb[14].mxu1 %vm189_vm6, %v951_v9  ;;  %2113 = vmatprep.subr.mxu0 %v2262_v52 }
 0x524   :  { %v2247_v59 = vpop.eup %2246  ;;  %2109 = vmatpush3.msra.mxu1 %v1337_v2  ;;  %2110 = vmatprep.mubr.msk.f32.mxu1 %vm2263_vm5, %v2262_v52 }
 0x525   :  { %v2249_v58 = vpop.eup %2248  ;;  %v953_v56 = vmul.f32 %v2247_v59, %v2231_v36  ;;  %2118 = vmatprep.subr.mxu1 %v2262_v52 }
 0x526   :  { %v952_v10 = vmul.f32 %v2249_v58, %v2233_v37 }
 0x527   :  { %2111 = vmatmul.mubr.msk.f32.vlgmr.msra.gmra.mrb[16].mxu1 %vm189_vm6, %v953_v56  ;;  %v1739_v56 = vld [vmem:[%s2633_s4] sm:$0xff] }
 0x528   :  { %v2251_v60 = vpop.eup %2250  ;;  %2106 = vmatmul.mubr.msk.f32.vlgmr.msra.gmra.mrb[10].mxu0 %vm189_vm6, %v952_v10  ;;  %2119 = vmatpush3.msra.mxu1 %v1489_v11  ;;  %v1740_v10 = vld [vmem:[%s2633_s4 + $0x8] sm:$0xff]  ;;  %v1741_v11 = vld [vmem:[%s2633_s4 + $0x10] sm:$0xff] }
 0x529   :  { %v2253_v13 = vpop.eup %2252  ;;  %v955_v57 = vmul.f32 %v2251_v60, %v2496_v41  ;;  %2114 = vmatpush3.msra.mxu0 %v1413_v12  ;;  %2115 = vmatprep.mubr.msk.f32.mxu0 %vm2263_vm5, %v2262_v52  ;;  %v2180_v60 = vpack.c.bf16 %v1740_v10, %v1739_v56  ;;  %v1742_v12 = vld [vmem:[%s2633_s4 + $0x18] sm:$0xff] }
 0x52a   :  { %v954_v15 = vmul.f32 %v2253_v13, %v2498_v42  ;;  %2120 = vmatprep.mubr.msk.f32.mxu1 %vm2263_vm5, %v2262_v52  ;;  %2173 = vmatprep.subr.bf16.mxu0 %v2172_v18  ;;  %v1598_v52 = vld [vmem:[%s2632_s3 + $0x10] sm:$0xff]  ;;  %v2184_v13 = vpack.c.bf16 %v1742_v12, %v1741_v11 }
 0x52b   :  { %2121 = vmatmul.mubr.msk.f32.vlgmr.msra.gmra.mrb[18].mxu1 %vm189_vm6, %v955_v57  ;;  %v2176_v20 = vpack.c.bf16 %v1599_v19, %v1598_v52  ;;  %2181 = vmatprep.subr.bf16.mxu1 %v2180_v60  ;;  %v1830_v57 = vld [vmem:[%s2634_s5] sm:$0xff]  ;;  %v1835_v52 = vld [vmem:[%s2634_s5 + $0x28] sm:$0xff] }
 0x52c   :  { %2116 = vmatmul.mubr.msk.f32.vlgmr.msra.gmra.mrb[12].mxu0 %vm189_vm6, %v954_v15  ;;  %2183 = vmatpush3.bf16.msra.mxu1 %v2180_v60  ;;  %v1831_v15 = vld [vmem:[%s2634_s5 + $0x8] sm:$0xff] }
 0x52d   :  { %2175 = vmatpush3.bf16.msra.mxu0 %v2172_v18  ;;  %2185 = vmatprep.subr.bf16.mxu1 %v2184_v13  ;;  %v1834_v18 = vld [vmem:[%s2634_s5 + $0x20] sm:$0xff] }
 0x52e   :  { %2177 = vmatprep.subr.bf16.mxu0 %v2176_v20  ;;  %v2196_v19 = vpack.c.bf16 %v1835_v52, %v1834_v18 }
 0x530   :  { %2187 = vmatpush3.bf16.msra.mxu1 %v2184_v13 }
 0x531   :  { %2179 = vmatpush3.bf16.msra.mxu0 %v2176_v20 }
 0x599   :  { %v1028_v62 = vpop.f32.mrb[6].mxu0 }
 0x59a   :  { %v2087_v14 = vpop.f32.mrb[7].mxu0 }
 0x59b   :  { %v2188_v14 = vpack.c.bf16 %v1831_v15, %v1830_v57 }
 0x59d   :  { %2189 = vmatprep.subr.bf16.mxu0 %v2188_v14 }
 0x5f2   :  { %v1104_v21 = vpop.f32.mrb[12].mxu1 }
 0x5f3   :  { %v1180_v22 = vpop.f32.mrb[8].mxu0  ;;  %v2092_v23 = vpop.f32.mrb[13].mxu1  ;;  %1565 = vrot.lane.b32.xlu0 %v1104_v21, %s2269_s14 }
 0x5f4   :  { %1569 = vrot.lane.b32.xlu1 %v1180_v22, %s2270_s15  ;;  %v2097_v24 = vpop.f32.mrb[9].mxu0 }
 0x5f6   :  { %v1256_v25 = vpop.f32.mrb[14].mxu1 }
 0x5f7   :  { %v2102_v26 = vpop.f32.mrb[15].mxu1 }
 0x5f8   :  { %1573 = vrot.lane.b32.xlu1 %v1256_v25, %s2271_s16 }
 0x5fa   :  { %v1408_v27 = vpop.f32.mrb[16].mxu1 }
 0x5fb   :  { %v1332_v28 = vpop.f32.mrb[10].mxu0  ;;  %v2112_v29 = vpop.f32.mrb[17].mxu1  ;;  %1582 = vrot.lane.b32.xlu0 %v1408_v27, %s2269_s14 }
 0x5fc   :  { %v2107_v31 = vpop.f32.mrb[11].mxu0 }
 0x5fe   :  { %v1560_v32 = vpop.f32.mrb[18].mxu1 }
 0x5ff   :  { %v1484_v33 = vpop.f32.mrb[12].mxu0  ;;  %v2122_v34 = vpop.f32.mrb[19].mxu1  ;;  %1590 = vrot.lane.b32.xlu1 %v1560_v32, %s2271_s16 }
 0x600   :  { %1586 = vrot.lane.b32.xlu0 %v1484_v33, %s2270_s15  ;;  %v2117_v35 = vpop.f32.mrb[13].mxu0 }
 0x601   :  { %v1709_v35 = vsub.s32 4, %v2342_v30 }
 0x665   :  { %v1566_v36 = vpop.permute.xlu0 %1565 }
 0x666   :  { %v1570_v37 = vpop.permute.xlu1 %1569  ;;  %v1576_v39 = vsel %vm189_vm6, %v1028_v62, %v1566_v36  ;;  %v1832_v62 = vld [vmem:[%s2634_s5 + $0x10] sm:$0xff] }
 0x667   :  { %v1578_v41 = vsel %vm1577_vm7, %v1576_v39, %v1570_v37  ;;  %v2192_v17 = vpack.c.bf16 %v1833_v16, %v1832_v62  ;;  %v1710_v39 = vrot.slane %v2348_v38, %v1709_v35 }
 0x66a   :  { %v1574_v40 = vpop.permute.xlu1 %1573 }
 0x66b   :  { %v1580_v42 = vsel %vm1579_vm8, %v1578_v41, %v1574_v40  ;;  %v1735_v40 = vsub.s32 5, %v2342_v30 }
 0x66c   :  { %2131 = vmatprep.mubr.msk.f32.mxu0 %vm29_vm0, %v1580_v42 }
 0x66d   :  { %v1583_v43 = vpop.permute.xlu0 %1582  ;;  %v1736_v42 = vrot.slane %v2348_v38, %v1735_v40 }
 0x66e   :  { %v1593_v45 = vsel %vm189_vm6, %v1332_v28, %v1583_v43 }
 0x671   :  { %v1591_v44 = vpop.permute.xlu1 %1590 }
 0x672   :  { %v1587_v46 = vpop.permute.xlu0 %1586 }
 0x673   :  { %v1594_v47 = vsel %vm1577_vm7, %v1593_v45, %v1587_v46 }
 0x674   :  { %v1595_v48 = vsel %vm1579_vm8, %v1594_v47, %v1591_v44 }
 0x675   :  { %2132 = vmatmul.mubr.msk.f32.vlgmr.msra.gmra.mrb[14].mxu0 %vm29_vm0, %v1595_v48 }
 0x676   :  { %2191 = vmatpush3.bf16.msra.mxu0 %v2188_v14 }
 0x677   :  { %2193 = vmatprep.subr.bf16.mxu0 %v2192_v17 }
 0x67a   :  { %2195 = vmatpush3.bf16.msra.mxu0 %v2192_v17 }
 0x67b   :  { %2197 = vmatprep.subr.bf16.mxu0 %v2196_v19 }
 0x67e   :  { %2199 = vmatpush3.bf16.msra.mxu0 %v2196_v19 }
 0x748   :  { %v2133_v2 = vpop.f32.mrb[14].mxu0 }
 0x749   :  { %v1682_v51 = vadd.f32 %v2133_v2, %v1603_v50  ;;  %v1676_v61 = vpop.f32.mrb[15].mxu0  ;;  %v1837_v2 = vld [vmem:[%s2634_s5 + $0x38] sm:$0xff] }
 0x74a   :  { %v1677_v53 = vadd.f32 %v1676_v61, %v1603_v50  ;;  %v1836_v50 = vld [vmem:[%s2634_s5 + $0x30] sm:$0xff]  ;;  %v1745_v61 = vsub.s32 6, %v2342_v30 }
 0x74b   :  { %v2554_v54 = vadd.f32 %v1682_v51, %v2320_v1  ;;  %v2200_v51 = vpack.c.bf16 %v1837_v2, %v1836_v50 }
 0x74c   :  { %v2557_v55 = vadd.f32 %v1677_v53, %v2315_v0  ;;  %v1746_v53 = vrot.slane %v2348_v38, %v1745_v61 }
 0x74d   :  { %v1690_v63 = vsel %vm29_vm0, %v2554_v54, 0.0  ;;  %2201 = vmatprep.subr.bf16.mxu0 %v2200_v51 }
 0x74e   :  { %1691 = vadd.xlane.f32.xlu1 %v1690_v63  ;;  %v1687_v3 = vsel %vm29_vm0, %v2557_v55, 0.0  ;;  %2203 = vmatpush3.bf16.msra.mxu0 %v2200_v51 }
 0x74f   :  { %1688 = vadd.xlane.f32.xlu0 %v1687_v3 }
 0x7db   :  { %v1692_v4 = vpop.xlane.xlu1 %1691 }
 0x7dc   :  { %v1694_v5 = vmul.f32 0.03125, %v1692_v4  ;;  %v1689_v6 = vpop.xlane.xlu0 %1688 }
 0x7dd   :  { %v1693_v7 = vmul.f32 0.03125, %v1689_v6 }
 0x7de   :  { %v2564_v8 = vsub.f32 %v2554_v54, %v1694_v5 }
 0x7df   :  { %v1695_v1 = vsub.f32 %v2557_v55, %v1693_v7 }
 0x7e0   :  { %v1698_v59 = vmul.f32 %v2564_v8, %v2564_v8  ;;  %v1712_v45 = vmul.f32 %v1710_v39, %v2564_v8  ;;  %v1840_v8 = vsub.s32 7, %v2342_v30 }
 0x7e1   :  { %v1697_v9 = vmul.f32 %v1695_v1, %v1695_v1  ;;  %v1711_v41 = vmul.f32 %v1710_v39, %v1695_v1 }
 0x7e2   :  { %v1702_v58 = vsel %vm29_vm0, %v1698_v59, 0.0  ;;  %v1841_v1 = vrot.slane %v2348_v38, %v1840_v8 }
 0x7e3   :  { %v1699_v0 = vsel %vm29_vm0, %v1697_v9, 0.0 }
 0x7e4   :  { %1700 = vadd.xlane.f32.xlu0 %v1699_v0 }
 0x7e8   :  { %1703 = vadd.xlane.f32.xlu0 %v1702_v58 }
 0x871   :  { %v1701_v20 = vpop.xlane.xlu0 %1700 }
 0x872   :  { %v1705_v21 = vmul.f32 0.032258064, %v1701_v20 }
 0x874   :  { %2254 = vrsqrt.f32 %v1705_v21  ;;  %vm1715_vm9 = vcmp.eq.f32.partialorder %v1705_v21, inf  ;;  %v1718_v26 = vand.u32 2147483648, %v1705_v21  ;;  %vm1717_vm10 = vcmp.eq.f32.partialorder %v1705_v21, 0.0 }
 0x875   :  { %v1704_v22 = vpop.xlane.xlu0 %1703 }
 0x876   :  { %v1706_v23 = vmul.f32 0.032258064, %v1704_v22 }
 0x878   :  { %2256 = vrsqrt.f32 %v1706_v23  ;;  %vm1722_vm11 = vcmp.eq.f32.partialorder %v1706_v23, inf  ;;  %v1725_v33 = vand.u32 2147483648, %v1706_v23  ;;  %vm1724_vm12 = vcmp.eq.f32.partialorder %v1706_v23, 0.0 }
 0x87e   :  { %v2255_v24 = vpop.eup %2254 }
 0x87f   :  { %v1714_v25 = vmul.f32 %v2255_v24, %v1705_v21 }
 0x881   :  { %v1716_v27 = vsel %vm1715_vm9, %v1705_v21, %v1714_v25 }
 0x882   :  { %v2257_v28 = vpop.eup %2256  ;;  %v1719_v29 = vsel %vm1717_vm10, %v1718_v26, %v1716_v27 }
 0x883   :  { %v1721_v31 = vmul.f32 %v2257_v28, %v1706_v23  ;;  %v1727_v32 = vadd.f32 1e-06, %v1719_v29 }
 0x885   :  { %v1723_v34 = vsel %vm1722_vm11, %v1706_v23, %v1721_v31  ;;  %2258 = vrcp.f32 %v1727_v32 }
 0x886   :  { %v1726_v36 = vsel %vm1724_vm12, %v1725_v33, %v1723_v34 }
 0x887   :  { %v1728_v37 = vadd.f32 1e-06, %v1726_v36 }
 0x889   :  { %2260 = vrcp.f32 %v1728_v37 }
 0x88f   :  { %v2259_v43 = vpop.eup %2258 }
 0x890   :  { %v1730_v44 = vmul.f32 %v2259_v43, %v1711_v41 }
 0x892   :  { %v1737_v46 = vadd.f32 %v1736_v42, %v1730_v44 }
 0x893   :  { %v2261_v47 = vpop.eup %2260 }
 0x894   :  { %v1732_v48 = vmul.f32 %v2261_v47, %v1712_v45  ;;  %2142 = vmatprep.mubr.msk.f32.mxu1 %vm29_vm0, %v1737_v46 }
 0x896   :  { %v1738_v49 = vadd.f32 %v1736_v42, %v1732_v48 }
 0x898   :  { %2143 = vmatmul.mubr.msk.f32.vlgmr.msra.gmra.mrb[20].mxu1 %vm29_vm0, %v1738_v49 }
 0x96b   :  { %v2144_v63 = vpop.f32.mrb[20].mxu1 }
 0x96c   :  { %v1825_v3 = vadd.f32 %v2144_v63, %v1746_v53  ;;  %v1819_v4 = vpop.f32.mrb[21].mxu1 }
 0x96d   :  { %v1820_v5 = vadd.f32 %v1819_v4, %v1746_v53 }
 0x96e   :  { %v1829_v7 = vmax.f32 %v1825_v3, 0.0 }
 0x96f   :  { %v1828_v6 = vmax.f32 %v1820_v5, 0.0 }
 0x971   :  { %2161 = vmatprep.mubr.msk.f32.mxu0 %vm1842_vm13, %v1828_v6 }
 0x972   :  { %2162 = vmatmul.mubr.msk.f32.vlgmr.msra.gmra.mrb[16].mxu0 %vm1842_vm13, %v1829_v7 }
 0xa45   :  { %v2163_v9 = vpop.f32.mrb[16].mxu0 }
 0xa46   :  { %v1921_v0 = vadd.f32 %v2163_v9, %v1841_v1  ;;  %v1915_v59 = vpop.f32.mrb[17].mxu0 }
 0xa47   :  { %v1916_v58 = vadd.f32 %v1915_v59, %v1841_v1 }
 0xa48   :  { %v1925_v56 = vadd.f32 %v1921_v0, %v2554_v54 }
 0xa49   :  { %v1924_v10 = vadd.f32 %v1916_v58, %v2557_v55 }
 0xa4a   :  { %1927 = vst.msk [vmem:[%s2635_s7 + $0x8] sm:$0xff] %vm29_vm0, %v1925_v56 }
 0xa4b   :  { %1926 = vst.msk [vmem:[%s2635_s7] sm:$0xff] %vm29_vm0, %v1924_v10 }

</bundles_post_ra>
